<compile_context>
chip_gen: v6e
topology: v6e:2x2x1
jax: 0.10.0
libtpu: 0.0.40
codegen_flags: <defaults>
</compile_context>

<pallas_src>
import functools

import jax
import jax.numpy as jnp
from jax.experimental import pallas as pl
from jax.experimental.pallas import tpu as pltpu


def _cls_forward_kernel(x_ref, wt_ref, b_ref, lab_ref, pred_ref, nll_ref):
    # x_ref  : (tm, H)  batch rows, streamed in stored dtype (cast on VPU, not in HBM)
    # wt_ref : (C, H)   transposed weights (tiny, resident every step)
    # b_ref  : (C, 1)   bias as a column so it broadcasts over the lane (sample) axis
    # lab_ref: (1, tm)  int32 labels, lane-dense
    # pred_ref / nll_ref : (1, tm) lane-dense outputs (argmax ids / per-sample NLL)
    x = x_ref[...].astype(jnp.float32)
    wt = wt_ref[...].astype(jnp.float32)

    # logits^T[c, m] = sum_h wt[c, h] * x[m, h]   (A @ B^T pattern -> MXU, f32 acc)
    logits = jax.lax.dot_general(
        wt, x, (((1,), (1,)), ((), ())),
        preferred_element_type=jnp.float32)                       # (C, tm)
    logits = logits + b_ref[...].astype(jnp.float32)              # lane broadcast

    num_classes = logits.shape[0]
    cls_ids = jax.lax.broadcasted_iota(jnp.int32, logits.shape, 0)  # (C, tm)

    # fused argmax (first max index -> matches jnp.argmax / torch.argmax)
    m = jnp.max(logits, axis=0, keepdims=True)                    # (1, tm)
    cls_f = cls_ids.astype(jnp.float32)
    pred = jnp.min(jnp.where(logits == m, cls_f, float(num_classes)),
                   axis=0, keepdims=True)                          # (1, tm)
    pred_ref[...] = pred.astype(jnp.int32)

    # numerically stable log-softmax + NLL, all per-lane (per-sample)
    z = logits - m
    lse = jnp.log(jnp.sum(jnp.exp(z), axis=0, keepdims=True))     # (1, tm)
    logp = z - lse                                                # (C, tm)
    labels = lab_ref[...]                                         # (1, tm) int32
    picked = jnp.sum(jnp.where(cls_ids == labels, logp, 0.0),
                     axis=0, keepdims=True)                       # (1, tm)
    nll_ref[...] = -picked
    # Garbage lanes from a ragged last tile stay in their own lanes and are clipped by
    # the (1, batch) output DMA, so no explicit validity mask is needed.


def _pick_tile(batch, hidden, itemsize, tm):
    """Choose the batch tile: large (amortize per-step overhead), 128-multiple
    (lane-dense labels/outputs), VMEM-budgeted, and >= 2 grid steps when possible."""
    # keep the double-buffered x tile comfortably inside the scoped-VMEM default
    vmem_budget = 16 << 20
    tm_vmem = max(128, (vmem_budget // (2 * hidden * itemsize)) // 128 * 128)
    tm = max(128, min(tm, tm_vmem))
    tm = (tm // 128) * 128
    # keep >= 2 grid steps so the "parallel" axis can shard across v7x's 2 TensorCores
    two_step = ((pl.cdiv(batch, 2) + 127) // 128) * 128
    tm = min(tm, two_step)
    if batch <= tm or batch <= 128:
        # single full-extent tile: block dims equal array dims, so no (8,128)
        # divisibility requirement and no ragged tail at all
        return batch, 1
    return tm, pl.cdiv(batch, tm)


@functools.partial(jax.jit, static_argnames=("tm",))
def model_forward(x, w, b, labels, *, tm=1024):
    """Concrete ModelBase.forward hot path.

    Returns (mean NLL loss, argmax class ids) as device arrays; string predictions are
    assembled lazily by `predictions_to_strings` so the host sync stays off the
    critical path.
    """
    batch, hidden = x.shape
    num_classes = w.shape[-1]

    tile_m, num_tiles = _pick_tile(batch, hidden, x.dtype.itemsize, tm)

    # tiny layout plumbing (all O(C*H) / O(batch) — negligible vs. streaming x)
    wt = w.T                                            # (C, H)
    b_col = b.reshape(num_classes, 1)                   # (C, 1)
    labels2d = labels.astype(jnp.int32).reshape(1, batch)

    flops = 2 * batch * hidden * num_classes
    bytes_accessed = (x.size * x.dtype.itemsize + w.size * w.dtype.itemsize
                      + b.size * b.dtype.itemsize + batch * 4 * 3)

    pred_ids, nll = pl.pallas_call(
        _cls_forward_kernel,
        out_shape=(
            jax.ShapeDtypeStruct((1, batch), jnp.int32),    # argmax ids (lane-dense)
            jax.ShapeDtypeStruct((1, batch), jnp.float32),  # per-sample NLL
        ),
        grid=(num_tiles,),
        in_specs=[
            pl.BlockSpec((tile_m, hidden), lambda i: (i, 0)),          # x rows
            pl.BlockSpec((num_classes, hidden), lambda i: (0, 0)),     # W^T (resident)
            pl.BlockSpec((num_classes, 1), lambda i: (0, 0)),          # bias column
            pl.BlockSpec((1, tile_m), lambda i: (0, i)),               # labels
        ],
        out_specs=(
            pl.BlockSpec((1, tile_m), lambda i: (0, i)),
            pl.BlockSpec((1, tile_m), lambda i: (0, i)),
        ),
        compiler_params=pltpu.CompilerParams(
            dimension_semantics=("parallel",)),
        cost_estimate=pl.CostEstimate(
            flops=flops,
            transcendentals=batch * num_classes,
            bytes_accessed=bytes_accessed),
    )(x, wt, b_col, labels2d)

    loss = jnp.sum(nll) / batch      # trivial XLA reduce; keeps the grid axis parallel
    return loss, pred_ids[0]


def predictions_to_strings(pred_ids, class_names):
    """Host-side string assembly. Blocking device_get + Python loop: call lazily."""
    return [class_names[int(i)] for i in jax.device_get(pred_ids)]


if __name__ == "__main__":
    hidden, num_classes = 32, 8
    class_names = [f"class_{i}" for i in range(num_classes)]
    key = jax.random.PRNGKey(0)

    # (batch=24, default tm)  -> single full-extent tile path
    # (batch=200, tm=128)     -> multi-tile grid with a ragged (clipped) last tile
    for batch, tm in ((24, 1024), (200, 128)):
        kx, kw, kb, kl, key = jax.random.split(key, 5)
        x = jax.random.normal(kx, (batch, hidden), dtype=jnp.float32)
        w = jax.random.normal(kw, (hidden, num_classes), dtype=jnp.float32) * 0.05
        b = jax.random.normal(kb, (num_classes,), dtype=jnp.float32) * 0.01
        labels = jax.random.randint(kl, (batch,), 0, num_classes)

        loss, pred_ids = model_forward(x, w, b, labels, tm=tm)
        loss, pred_ids = jax.block_until_ready((loss, pred_ids))

        # pure-JAX float32 reference
        logits_ref = x @ w + b.reshape(1, -1)
        logp_ref = jax.nn.log_softmax(logits_ref, axis=-1)
        loss_ref = -jnp.mean(logp_ref[jnp.arange(batch), labels])
        pred_ref = jnp.argmax(logits_ref, axis=-1)

        assert jnp.allclose(loss, loss_ref, atol=1e-4, rtol=1e-4), (batch, loss, loss_ref)
        assert jnp.array_equal(pred_ids, pred_ref.astype(jnp.int32)), batch

        preds = predictions_to_strings(pred_ids, class_names)   # off the hot path
        assert len(preds) == batch and all(isinstance(p, str) for p in preds)
        assert preds == [class_names[int(i)] for i in jax.device_get(pred_ref)]

    print("KERNEL_OK")
</pallas_src>

<mosaic_0001>
module attributes {stable_mosaic.version = 11 : i64} {
  func.func @_cls_forward_kernel(%arg0: i32, %arg1: memref<24x32xf32, #tpu.memory_space<vmem>>, %arg2: memref<8x32xf32, #tpu.memory_space<vmem>>, %arg3: memref<8x1xf32, #tpu.memory_space<vmem>>, %arg4: memref<1x24xi32, #tpu.memory_space<vmem>>, %arg5: memref<1x24xi32, #tpu.memory_space<vmem>>, %arg6: memref<1x24xf32, #tpu.memory_space<vmem>>) attributes {dimension_semantics = [#tpu.dimension_semantics<parallel>], iteration_bounds = array<i64: 1>, scalar_prefetch = 0 : i64, scratch_operands = 0 : i64, tpu.core_type = #tpu.core_type<tc>, window_params = [{transform_indices = @transform_0, window_bounds = array<i64: 24, 32>}, {pipeline_mode = #tpu.pipeline_mode<synchronous>, transform_indices = @transform_1, window_bounds = array<i64: 8, 32>}, {pipeline_mode = #tpu.pipeline_mode<synchronous>, transform_indices = @transform_2, window_bounds = array<i64: 8, 1>}, {transform_indices = @transform_3, window_bounds = array<i64: 1, 24>}, {transform_indices = @transform_4, window_bounds = array<i64: 1, 24>}, {transform_indices = @transform_5, window_bounds = array<i64: 1, 24>}]} {
    %c0 = arith.constant 0 : index
    %c0_0 = arith.constant 0 : index
    %0 = vector.load %arg1[%c0, %c0_0] : memref<24x32xf32, #tpu.memory_space<vmem>>, vector<24x32xf32>
    %c0_1 = arith.constant 0 : index
    %c0_2 = arith.constant 0 : index
    %1 = vector.load %arg2[%c0_1, %c0_2] : memref<8x32xf32, #tpu.memory_space<vmem>>, vector<8x32xf32>
    %cst = arith.constant dense<0.000000e+00> : vector<8x24xf32>
    %2 = tpu.matmul %1, %0, %cst {dimension_numbers = #tpu.dot_dimension_numbers<[1], [1], [0], [0], [0, 0, 1, 0], [], []>} : vector<8x32xf32>, vector<24x32xf32>, vector<8x24xf32> -> vector<8x24xf32>
    %c0_3 = arith.constant 0 : index
    %c0_4 = arith.constant 0 : index
    %3 = vector.load %arg3[%c0_3, %c0_4] : memref<8x1xf32, #tpu.memory_space<vmem>>, vector<8x1xf32>
    %4 = vector.broadcast %3 : vector<8x1xf32> to vector<8x24xf32>
    %5 = arith.addf %2, %4 : vector<8x24xf32>
    %6 = tpu.iota {dimensions = array<i32: 0>} : vector<8x24xi32>
    %cst_5 = arith.constant dense<0xFF800000> : vector<24xf32>
    %7 = vector.multi_reduction <maximumf>, %5, %cst_5 [0] : vector<8x24xf32> to vector<24xf32>
    %8 = vector.shape_cast %7 : vector<24xf32> to vector<1x24xf32>
    %9 = arith.sitofp %6 : vector<8x24xi32> to vector<8x24xf32>
    %10 = vector.broadcast %8 : vector<1x24xf32> to vector<8x24xf32>
    %11 = arith.cmpf oeq, %5, %10 : vector<8x24xf32>
    %cst_6 = arith.constant 8.000000e+00 : f32
    %12 = vector.broadcast %cst_6 : f32 to vector<8x24xf32>
    %13 = arith.select %11, %9, %12 : vector<8x24xi1>, vector<8x24xf32>
    %cst_7 = arith.constant dense<0x7F800000> : vector<24xf32>
    %14 = vector.multi_reduction <minimumf>, %13, %cst_7 [0] : vector<8x24xf32> to vector<24xf32>
    %15 = vector.shape_cast %14 : vector<24xf32> to vector<1x24xf32>
    %16 = arith.fptosi %15 : vector<1x24xf32> to vector<1x24xi32>
    %c0_8 = arith.constant 0 : index
    %c0_9 = arith.constant 0 : index
    %17 = vector.load %arg5[%c0_8, %c0_9] : memref<1x24xi32, #tpu.memory_space<vmem>>, vector<1x24xi32>
    tpu.vector_store %arg5[%c0_8, %c0_9], %16 {strides = array<i32>} : memref<1x24xi32, #tpu.memory_space<vmem>>, vector<1x24xi32>,
    %18 = vector.broadcast %8 : vector<1x24xf32> to vector<8x24xf32>
    %19 = arith.subf %5, %18 : vector<8x24xf32>
    %20 = math.exp %19 : vector<8x24xf32>
    %cst_10 = arith.constant dense<0.000000e+00> : vector<24xf32>
    %21 = vector.multi_reduction <add>, %20, %cst_10 [0] : vector<8x24xf32> to vector<24xf32>
    %22 = vector.shape_cast %21 : vector<24xf32> to vector<1x24xf32>
    %23 = math.log %22 : vector<1x24xf32>
    %24 = vector.broadcast %23 : vector<1x24xf32> to vector<8x24xf32>
    %25 = arith.subf %19, %24 : vector<8x24xf32>
    %c0_11 = arith.constant 0 : index
    %c0_12 = arith.constant 0 : index
    %26 = vector.load %arg4[%c0_11, %c0_12] : memref<1x24xi32, #tpu.memory_space<vmem>>, vector<1x24xi32>
    %27 = vector.broadcast %26 : vector<1x24xi32> to vector<8x24xi32>
    %28 = arith.cmpi eq, %6, %27 : vector<8x24xi32>
    %cst_13 = arith.constant 0.000000e+00 : f32
    %29 = vector.broadcast %cst_13 : f32 to vector<8x24xf32>
    %30 = arith.select %28, %25, %29 : vector<8x24xi1>, vector<8x24xf32>
    %cst_14 = arith.constant dense<0.000000e+00> : vector<24xf32>
    %31 = vector.multi_reduction <add>, %30, %cst_14 [0] : vector<8x24xf32> to vector<24xf32>
    %32 = vector.shape_cast %31 : vector<24xf32> to vector<1x24xf32>
    %cst_15 = arith.constant 0.000000e+00 : f32
    %33 = vector.broadcast %cst_15 : f32 to vector<1x24xf32>
    %34 = arith.subf %33, %32 : vector<1x24xf32>
    %c0_16 = arith.constant 0 : index
    %c0_17 = arith.constant 0 : index
    %35 = vector.load %arg6[%c0_16, %c0_17] : memref<1x24xf32, #tpu.memory_space<vmem>>, vector<1x24xf32>
    tpu.vector_store %arg6[%c0_16, %c0_17], %34 {strides = array<i32>} : memref<1x24xf32, #tpu.memory_space<vmem>>, vector<1x24xf32>,
    return
  }
  func.func @transform_0(%arg0: i32) -> (i32, i32) {
    %c0_i32 = arith.constant 0 : i32
    %c0_i32_0 = arith.constant 0 : i32
    return %arg0, %c0_i32 : i32, i32
  }
  func.func @transform_1(%arg0: i32) -> (i32, i32) {
    %c0_i32 = arith.constant 0 : i32
    %c0_i32_0 = arith.constant 0 : i32
    %c0_i32_1 = arith.constant 0 : i32
    return %c0_i32, %c0_i32_0 : i32, i32
  }
  func.func @transform_2(%arg0: i32) -> (i32, i32) {
    %c0_i32 = arith.constant 0 : i32
    %c0_i32_0 = arith.constant 0 : i32
    %c0_i32_1 = arith.constant 0 : i32
    return %c0_i32, %c0_i32_0 : i32, i32
  }
  func.func @transform_3(%arg0: i32) -> (i32, i32) {
    %c0_i32 = arith.constant 0 : i32
    %c0_i32_0 = arith.constant 0 : i32
    return %c0_i32, %arg0 : i32, i32
  }
  func.func @transform_4(%arg0: i32) -> (i32, i32) {
    %c0_i32 = arith.constant 0 : i32
    %c0_i32_0 = arith.constant 0 : i32
    return %c0_i32, %arg0 : i32, i32
  }
  func.func @transform_5(%arg0: i32) -> (i32, i32) {
    %c0_i32 = arith.constant 0 : i32
    %c0_i32_0 = arith.constant 0 : i32
    return %c0_i32, %arg0 : i32, i32
  }
}

</mosaic_0001>

<bundles_post_ra>
// kernel: model_forward.1
= control target key start
LH: loop header
LB: loop body
LE: loop exit
PB: predicated region body
PF: predicated region fallthrough
CT: control target
= control target key end

     0   :  { %11 = vsyncpa [#allocation3], 0  ;;  %s335_s0 = inlined_call_operand.hbm [shape: f32[24,32], index: 0, kind: input, shape index: {}]   ;;  %s336_s1 = inlined_call_operand.vmem [shape: f32[8,32], index: 1, kind: input, shape index: {}]   ;;  %s337_s2 = inlined_call_operand.vmem [shape: f32[8,1], index: 2, kind: input, shape index: {}]   ;;  %s338_s3 = inlined_call_operand.vmem [shape: s32[1,24], index: 3, kind: input, shape index: {}]   ;;  %s339_s4 = inlined_call_operand.hbm [shape: s32[1,24], index: 4, kind: output, shape index: {0}]   ;;  %s340_s5 = inlined_call_operand.vmem [shape: f32[1,24], index: 5, kind: output, shape index: {1}]  }
   0x1   :  { %12 = vsyncpa [#allocation4], 0  ;;  %s274_s18 = smov [#allocation2]  }
   0x2   :  { %s18_s19 = sshll.u32 %s274_s18, 4  ;;  %s19_s19 = int_to_ptr.vmem [resolvable:$true] %s18_s19 }
   0x3   :  { %s238_s20 = scalar_lea.vmem %s19_s19, 384  ;;  %p243_p1 = scmp.lt.s32.totalorder %s19_s19, %s19_s19 }
   0x4   :  { %p239_p0 = scmp.ne.s32.totalorder %s19_s19, %s238_s20  ;;  %p244_p2 = scmp.lt.s32.totalorder %s238_s20, %s238_s20 }
   0x6   :  { %p245_p3 = por %p244_p2, %p243_p1 }
   0x8   :  { %p246_p4 = pnand %p245_p3, %p239_p0 }
   0xa   :  { %249 = shalt.err (!%p246_p4)
}
   0xb   :  { %s275_s21 = smov 128   ;;  %s276_s22 = smov 8  }
   0xc   :  { %24 = dma.hbm_to_vmem [thread:$0]  %s335_s0, 384, %s19_s19, [#allocation3], %s275_s21, %s275_s21, %s276_s22  }
   0xd   :  { %270 = dma.done.wait [#allocation3], 384  }
   0xe   :  { %271 = vsyncadd [#allocation3], 4294966912  ;;  %v277_v0 = vmov 0.0   ;;  %vm278_vm0 = vmmov 0   ;;  %v279_v1 = vmov 0   ;;  %vm44_vm1 = vcmask 261120  }
   0xf   :  { %207 = vmatprep.subr.mxu0 %v277_v0  ;;  %213 = vmatprep.mubr.msk.f32.mxu0 %vm278_vm0, %v277_v0  ;;  %v36_v2 = vld [vmem:[#allocation2 + $0x10] sm:$0xff]  ;;  %v38_v3 = vld [vmem:[%s337_s2] sm:$0xff]  ;;  %v35_v4 = vld [vmem:[#allocation2 + $0x8] sm:$0xff]  ;;  %vm129_vm2 = vcmask 195584   ;;  %v127_v13 = vlaneseq  ;;  %vm148_vm4 = vcmask 188416  }
  0x10   :  { %225 = vset.pattern.permute.xlu0 %v279_v1  ;;  %208 = vmatpush3.xpose.msk.msra.mxu0 %vm44_vm1, %v36_v2  ;;  %v34_v5 = vld [vmem:[#allocation2] sm:$0xff] }
  0x11   :  { %209 = vmatprep.subr.mxu0 %v277_v0  ;;  %41 = vperm.xlu0 %225, %v38_v3   ;;  %v37_v6 = vld [vmem:[%s336_s1] sm:$0xff]  ;;  %v128_v16 = vshrl.u32 %v127_v13, 7  ;;  %s280_s1 = smov [#allocation5]  }
  0x12   :  { %s185_s2 = sshll.u32 %s280_s1, 4  ;;  %s186_s2 = int_to_ptr.vmem [resolvable:$true] %s185_s2 }
  0x13   :  { %v137_v19 = vcvt.s32.f32 %v128_v16  ;;  %s250_s28 = scalar_lea.vmem %s186_s2, 16  ;;  %s254_s29 = scalar_lea.vmem %s186_s2, 32 }
  0x14   :  { %210 = vmatpush3.xpose.msk.msra.mxu0 %vm44_vm1, %v35_v4  ;;  %p251_p5 = scmp.ne.s32.totalorder %s186_s2, %s250_s28  ;;  %p255_p6 = scmp.lt.s32.totalorder %s186_s2, %s186_s2 }
  0x15   :  { %211 = vmatprep.subr.mxu0 %v277_v0  ;;  %p256_p7 = scmp.lt.s32.totalorder %s254_s29, %s250_s28 }
  0x17   :  { %p257_p8 = por %p256_p7, %p255_p6 }
  0x18   :  { %212 = vmatpush3.xpose.msk.msra.mxu0 %vm44_vm1, %v34_v5 }
  0x19   :  { %p258_p9 = pnand %p257_p8, %p251_p5 }
  0x1b   :  { %214 = vmatmul.mubr.msk.f32.vlgmr.msra.gmra.mxu0 %vm44_vm1, %v37_v6 }
  0x8c   :  { %v42_v7 = vpop.permute.xlu0 %41 }
  0xdb   :  { %v123_v8 = vpop.f32.mrf.mxu0 }
  0xdc   :  { %v124_v9 = vadd.f32 %v123_v8, %v42_v7 }
  0xdd   :  { %v215_v10 = vpop.f32.mrf.mxu0 }
  0xde   :  { %v130_v11 = vsel %vm129_vm2, %v124_v9, -inf }
  0xdf   :  { %v131_v12 = vrot.slane %v130_v11, 4 }
  0xe1   :  { %v132_v14 = vmax.f32 %v130_v11, %v131_v12 }
  0xe3   :  { %v133_v15 = vrot.slane %v132_v14, 2 }
  0xe5   :  { %v134_v17 = vmax.f32 %v132_v14, %v133_v15 }
  0xe7   :  { %v135_v18 = vrot.slane %v134_v17, 1 }
  0xe9   :  { %v136_v20 = vmax.f32 %v134_v17, %v135_v18 }
  0xeb   :  { %vm138_vm3 = vcmp.eq.f32.partialorder %v124_v9, %v136_v20  ;;  %v150_v21 = vsub.f32 %v124_v9, %v136_v20 }
  0xec   :  { %v139_v22 = vsel %vm138_vm3, %v137_v19, 8.0 }
  0xed   :  { %v140_v23 = vsel %vm129_vm2, %v139_v22, inf  ;;  %v151_v24 = vmul.f32 1.442695, %v150_v21 }
  0xee   :  { %v141_v25 = vrot.slane %v140_v23, 4 }
  0xef   :  { %226 = vpow2.f32 %v151_v24 }
  0xf0   :  { %v142_v26 = vmin.f32 %v140_v23, %v141_v25 }
  0xf2   :  { %v143_v27 = vrot.slane %v142_v26, 2 }
  0xf4   :  { %v144_v28 = vmin.f32 %v142_v26, %v143_v27 }
  0xf6   :  { %v145_v29 = vrot.slane %v144_v28, 1 }
  0xf8   :  { %v146_v30 = vmin.f32 %v144_v28, %v145_v29 }
  0xfa   :  { %v216_v31 = vtrunc.f32 %v146_v30 }
  0xfc   :  { %v227_v32 = vpop.eup %226  ;;  %v217_v33 = vcvt.f32.s32 %v216_v31 }
  0xfd   :  { %v153_v34 = vsel %vm129_vm2, %v227_v32, 0.0 }
  0xfe   :  { %v154_v35 = vrot.slane %v153_v34, 4  ;;  %149 = vst.msk [vmem:[#allocation5] sm:$0x1] %vm148_vm4, %v217_v33 }
  0xff   :  { %261 = shalt.err (!%p258_p9)
}
 0x100   :  { %188 = dma.vmem_to_hbm [thread:$0]  %s186_s2, 16, %s339_s4, [#allocation4]   ;;  %v155_v36 = vadd.f32 %v154_v35, %v153_v34  ;;  %v202_v41 = vld [vmem:[%s338_s3] ss:$0 sm:$0xff] }
 0x101   :  { %vm168_vm5 = vcmp.eq.s32.totalorder %v128_v16, %v202_v41 }
 0x102   :  { %v156_v37 = vrot.slane %v155_v36, 2 }
 0x104   :  { %v157_v38 = vadd.f32 %v156_v37, %v155_v36 }
 0x106   :  { %v158_v39 = vrot.slane %v157_v38, 1 }
 0x108   :  { %v159_v40 = vadd.f32 %v158_v39, %v157_v38 }
 0x10a   :  { %228 = vlog2.f32 %v159_v40 }
 0x117   :  { %v229_v42 = vpop.eup %228 }
 0x118   :  { %v161_v43 = vmul.f32 0.6931472, %v229_v42 }
 0x11a   :  { %v162_v44 = vsub.f32 %v150_v21, %v161_v43 }
 0x11c   :  { %v169_v45 = vsel %vm168_vm5, %v162_v44, 0.0 }
 0x11d   :  { %v170_v46 = vsel %vm129_vm2, %v169_v45, 0.0 }
 0x11e   :  { %v171_v47 = vrot.slane %v170_v46, 4 }
 0x120   :  { %v172_v48 = vadd.f32 %v171_v47, %v170_v46 }
 0x122   :  { %v173_v49 = vrot.slane %v172_v48, 2 }
 0x124   :  { %v174_v50 = vadd.f32 %v173_v49, %v172_v48 }
 0x126   :  { %v175_v51 = vrot.slane %v174_v50, 1 }
 0x128   :  { %v176_v52 = vadd.f32 %v175_v51, %v174_v50 }
 0x12a   :  { %v177_v53 = vsub.f32 0.0, %v176_v52 }
 0x12c   :  { %178 = vst.msk [vmem:[%s340_s5] sm:$0x1] %vm148_vm4, %v177_v53 }
 0x12d   :  { %272 = dma.done.wait [#allocation4], 16  }
 0x12e   :  { %273 = vsyncadd [#allocation4], 4294967280 }
 0x12f   :  { %196 = vsyncpa [#allocation3], 1 }
 0x130   :  { %197 = vsyncpa [#allocation4], 1 }

</bundles_post_ra>
